<compile_context>
chip_gen: v7x
topology: tpu7x:2x2x1
jax: 0.10.0
libtpu: 0.0.40
codegen_flags: <defaults>
</compile_context>

<pallas_src>
import jax
import jax.numpy as jnp
from jax.experimental import pallas as pl
from jax.experimental.pallas import tpu as pltpu


def _cdiv(a, b):
    return (a + b - 1) // b


def _round_up(a, b):
    return _cdiv(a, b) * b


# ------------------------------ Pallas kernel --------------------------------

def _conv_bn_relu_kernel(x_ref, w_ref, b_ref, o_ref, acc_ref):
    """One (batch, spatial-tile, k-tile) grid cell of  o = relu(W @ x + b).

    x_ref:   (TK, TN)  activation tile (bf16 or f32; same dtype as w_ref)
    w_ref:   (C2, TK)  BN-folded conv weight tile
    b_ref:   (C2, 1)   BN-folded bias (f32)
    o_ref:   (C2, TN)  lane-dense output tile (written on last k step only)
    acc_ref: (C2, TN)  f32 accumulator scratch, resident across the k axis
    """
    k = pl.program_id(2)

    @pl.when(k == 0)
    def _():
        acc_ref[...] = jnp.zeros_like(acc_ref)

    acc_ref[...] += jnp.dot(w_ref[...], x_ref[...],
                            preferred_element_type=jnp.float32)   # MXU, f32 acc

    @pl.when(k == pl.num_programs(2) - 1)
    def _():
        o_ref[...] = jnp.maximum(acc_ref[...] + b_ref[...], 0.0).astype(o_ref.dtype)


# ------------------------------ tile selection --------------------------------

_VMEM_TILE_BUDGET = 24 << 20     # fits v7x (64 MiB phys / 32 MiB scoped) w/ headroom
_LANE_TILE_TARGET = 1024         # measured HBM-roofline sweet spot on v5e/v6e
_MIN_GRID_STEPS = 8              # keep both v7x TensorCores' pipelines fed


def _pick_k_tile(c1):
    """Full C1 unless it is large; then a 128-multiple divisor (keeps lane tile big)."""
    if c1 <= 1024:
        return c1
    for tk in (1024, 512, 256, 128):
        if c1 % tk == 0:
            return tk
    return c1


def _pick_lane_tile(hw_pad, tk, c2, x_bytes, out_bytes, w_total_bytes, batch):
    """Largest 128-multiple lane tile under the VMEM budget, with enough grid steps."""
    per_col = 2 * (tk * x_bytes + c2 * out_bytes) + c2 * 4   # 2x-buffered x/out + f32 acc
    fit = max(_VMEM_TILE_BUDGET - 2 * w_total_bytes, per_col * 128) // per_col
    fit = max(128, (fit // 128) * 128)
    tn = max(128, min(_LANE_TILE_TARGET, fit, hw_pad))
    # megacore (v7x): shrink the tile until there are enough steps to double-buffer
    while tn > 128 and batch * _cdiv(hw_pad, tn) < _MIN_GRID_STEPS:
        tn -= 128
    return tn


# --------------------------------- wrapper -------------------------------------

def conv_module_forward(x_nchw, w_folded, b_folded, out_dtype=None):
    """relu(bn(conv1x1(x))) with eval-mode BN pre-folded into (w_folded, b_folded).

    x_nchw:   (B, C1, H, W)  f32 or bf16 (bf16 halves HBM traffic; op is mem-bound)
    w_folded: (C2, C1)       BN-folded weight; cast (tiny) to x's dtype if needed
    b_folded: (C2, 1)        BN-folded bias (kept f32)
    out_dtype: output dtype (default: x's dtype)
    returns:  (B, C2, H, W)
    """
    B, C1, H, W = x_nchw.shape
    C2 = w_folded.shape[0]
    HW = H * W
    out_dtype = jnp.dtype(out_dtype) if out_dtype is not None else x_nchw.dtype

    if w_folded.dtype != x_nchw.dtype:
        w_folded = w_folded.astype(x_nchw.dtype)        # one-off, tiny
    b_folded = b_folded.reshape(C2, 1).astype(jnp.float32)

    # Lane-dense NCHW: H*W sits on the lane axis.  Pad it to a 128 multiple only
    # when needed so every store is an unmasked full-lane vst.
    x3 = x_nchw.reshape(B, C1, HW)
    HW_pad = max(128, _round_up(HW, 128))
    if HW_pad != HW:
        x3 = jnp.pad(x3, ((0, 0), (0, 0), (0, HW_pad - HW)))

    x_bytes = x3.dtype.itemsize
    out_bytes = jnp.dtype(out_dtype).itemsize
    w_bytes = w_folded.dtype.itemsize

    tk = _pick_k_tile(C1)
    tn = _pick_lane_tile(HW_pad, tk, C2, x_bytes, out_bytes, C2 * C1 * w_bytes, B)
    grid = (B, _cdiv(HW_pad, tn), _cdiv(C1, tk))

    vmem_need = (2 * tk * tn * x_bytes + 2 * C2 * tn * out_bytes
                 + 2 * C2 * tk * w_bytes + C2 * tn * 4 + 2 * C2 * 4)
    vmem_limit = int(min(max(int(1.5 * vmem_need) + (2 << 20), 32 << 20), 60 << 20))

    cost = pl.CostEstimate(
        flops=2 * B * C1 * C2 * HW_pad,
        transcendentals=0,
        bytes_accessed=(x3.size * x_bytes + C2 * C1 * w_bytes + C2 * 4
                        + B * C2 * HW_pad * out_bytes))

    y = pl.pallas_call(
        _conv_bn_relu_kernel,
        out_shape=jax.ShapeDtypeStruct((B, C2, HW_pad), out_dtype),
        grid=grid,
        in_specs=[
            pl.BlockSpec((None, tk, tn), lambda b, n, k: (b, k, n)),   # x tile
            pl.BlockSpec((C2, tk), lambda b, n, k: (0, k)),            # weight tile
            pl.BlockSpec((C2, 1), lambda b, n, k: (0, 0)),             # bias (invariant)
        ],
        out_specs=pl.BlockSpec((None, C2, tn), lambda b, n, k: (b, 0, n)),
        scratch_shapes=[pltpu.VMEM((C2, tn), jnp.float32)],
        compiler_params=pltpu.CompilerParams(
            dimension_semantics=("parallel", "parallel", "arbitrary"),
            vmem_limit_bytes=vmem_limit),
        cost_estimate=cost,
    )(x3, w_folded, b_folded)

    if HW_pad != HW:
        y = y[:, :, :HW]
    return y.reshape(B, C2, H, W)


# --------------------------- parameter preparation ----------------------------

def init_conv_module_params(key, c1, c2):
    """PyTorch-layout parameters: Conv2d weight (C2, C1, 1, 1) + BN buffers."""
    k1, k2, k3, k4, k5 = jax.random.split(key, 5)
    return {
        'conv_w': jax.random.normal(k1, (c2, c1, 1, 1), jnp.float32) / (c1 ** 0.5),
        'bn_gamma': 1.0 + 0.1 * jax.random.normal(k2, (c2,), jnp.float32),
        'bn_beta': 0.1 * jax.random.normal(k3, (c2,), jnp.float32),
        'bn_mean': 0.1 * jax.random.normal(k4, (c2,), jnp.float32),
        'bn_var': jax.random.uniform(k5, (c2,), jnp.float32, minval=0.5, maxval=1.5),
    }


def fold_conv_bn(params, eps=1e-5, compute_dtype=jnp.bfloat16):
    """Fold eval-mode BatchNorm into the 1x1 conv (done once, off the hot path).

    relu(bn(conv(x))) == relu((scale*W) @ x + shift)
      scale = gamma / sqrt(var + eps),  shift = beta - mean * scale
    """
    # TODO(synk): training-mode BatchNorm (batch statistics + running-stat
    # updates) is not implemented; this is the eval/inference path only.
    w = params['conv_w'][:, :, 0, 0]                          # (C2, C1)
    scale = params['bn_gamma'] / jnp.sqrt(params['bn_var'] + eps)
    shift = params['bn_beta'] - params['bn_mean'] * scale
    w_folded = (w * scale[:, None]).astype(compute_dtype)     # (C2, C1)
    b_folded = shift.reshape(-1, 1).astype(jnp.float32)       # (C2, 1)
    return w_folded, b_folded


# ------------------------------ pure-JAX checks -------------------------------

def conv_module_reference(x_nchw, params, eps=1e-5):
    """Unfused f32 reference: Conv2d(1x1, bias=False) -> BN(eval) -> ReLU."""
    w = params['conv_w'][:, :, 0, 0]                          # (C2, C1)
    y = (x_nchw[:, None] * w[None, :, :, None, None]).sum(axis=2)
    scale = params['bn_gamma'] / jnp.sqrt(params['bn_var'] + eps)
    shift = params['bn_beta'] - params['bn_mean'] * scale
    y = y * scale[None, :, None, None] + shift[None, :, None, None]
    return jnp.maximum(y, 0.0)


def folded_reference(x_nchw, w_folded, b_folded):
    """Same math as the kernel (incl. operand dtype), as plain element-wise JAX."""
    xc = x_nchw.astype(w_folded.dtype).astype(jnp.float32)
    wc = w_folded.astype(jnp.float32)
    y = (xc[:, None] * wc[None, :, :, None, None]).sum(axis=2)
    return jnp.maximum(y + b_folded.reshape(1, -1, 1, 1), 0.0)


# ----------------------------------- main -------------------------------------

if __name__ == "__main__":
    B, C1, C2, H, W = 2, 4, 32, 16, 16
    kx, kp = jax.random.split(jax.random.PRNGKey(0))
    x32 = jax.random.normal(kx, (B, C1, H, W), jnp.float32)
    params = init_conv_module_params(kp, C1, C2)

    fwd = jax.jit(conv_module_forward, static_argnames=("out_dtype",))

    # (a) f32 activation/weight/output stream: exact eval-mode module semantics
    w32, b32 = fold_conv_bn(params, compute_dtype=jnp.float32)
    out32 = fwd(x32, w32, b32, out_dtype=jnp.float32)
    jax.block_until_ready(out32)
    assert out32.shape == (B, C2, H, W) and out32.dtype == jnp.float32
    ref = conv_module_reference(x32, params)
    assert bool(jnp.allclose(out32, ref, atol=1e-3, rtol=1e-3)), \
        float(jnp.max(jnp.abs(out32 - ref)))

    # (b) bf16 end-to-end stream (x cast once at its producer, bf16 output):
    #     perf default for the HBM-bandwidth-bound 1x1 conv on v5e/v6e/v7x.
    xbf = x32.astype(jnp.bfloat16)
    wbf, bbf = fold_conv_bn(params, compute_dtype=jnp.bfloat16)
    outbf = fwd(xbf, wbf, bbf)
    jax.block_until_ready(outbf)
    assert outbf.shape == (B, C2, H, W) and outbf.dtype == jnp.bfloat16
    refbf = folded_reference(xbf, wbf, bbf).astype(jnp.bfloat16).astype(jnp.float32)
    assert bool(jnp.allclose(outbf.astype(jnp.float32), refbf, atol=3e-2, rtol=3e-2)), \
        float(jnp.max(jnp.abs(outbf.astype(jnp.float32) - refbf)))

    print("KERNEL_OK")
</pallas_src>

<mosaic_0001>
module attributes {stable_mosaic.version = 11 : i64} {
  func.func @_conv_bn_relu_kernel(%arg0: i32, %arg1: i32, %arg2: i32, %arg3: memref<1x4x128xf32, #tpu.memory_space<vmem>>, %arg4: memref<32x4xf32, #tpu.memory_space<vmem>>, %arg5: memref<32x1xf32, #tpu.memory_space<vmem>>, %arg6: memref<1x32x128xf32, #tpu.memory_space<vmem>>, %arg7: memref<32x128xf32, #tpu.memory_space<vmem>>) attributes {dimension_semantics = [#tpu.dimension_semantics<parallel>, #tpu.dimension_semantics<parallel>, #tpu.dimension_semantics<arbitrary>], iteration_bounds = array<i64: 2, 2, 1>, scalar_prefetch = 0 : i64, scratch_operands = 1 : i64, tpu.core_type = #tpu.core_type<tc>, window_params = [{transform_indices = @transform_0, window_bounds = array<i64: 1, 4, 128>}, {transform_indices = @transform_1, window_bounds = array<i64: 32, 4>}, {pipeline_mode = #tpu.pipeline_mode<synchronous>, transform_indices = @transform_2, window_bounds = array<i64: 32, 1>}, {transform_indices = @transform_3, window_bounds = array<i64: 1, 32, 128>}]} {
    %c0_i32 = arith.constant 0 : i32
    %0 = arith.cmpi eq, %arg2, %c0_i32 : i32
    %1 = arith.extui %0 : i1 to i32
    %c0_i32_0 = arith.constant 0 : i32
    %2 = arith.cmpi ne, %1, %c0_i32_0 : i32
    scf.if %2 {
      %cst_11 = arith.constant 0.000000e+00 : f32
      %13 = vector.broadcast %cst_11 : f32 to vector<32x128xf32>
      %c0_12 = arith.constant 0 : index
      %c0_13 = arith.constant 0 : index
      %14 = vector.load %arg7[%c0_12, %c0_13] : memref<32x128xf32, #tpu.memory_space<vmem>>, vector<32x128xf32>
      tpu.vector_store %arg7[%c0_12, %c0_13], %13 {strides = array<i32>} : memref<32x128xf32, #tpu.memory_space<vmem>>, vector<32x128xf32>,
    } else {
    }
    %c0 = arith.constant 0 : index
    %c0_1 = arith.constant 0 : index
    %3 = vector.load %arg7[%c0, %c0_1] : memref<32x128xf32, #tpu.memory_space<vmem>>, vector<32x128xf32>
    %c0_2 = arith.constant 0 : index
    %c0_3 = arith.constant 0 : index
    %4 = vector.load %arg4[%c0_2, %c0_3] : memref<32x4xf32, #tpu.memory_space<vmem>>, vector<32x4xf32>
    %c0_4 = arith.constant 0 : index
    %c0_5 = arith.constant 0 : index
    %c0_6 = arith.constant 0 : index
    %5 = vector.load %arg3[%c0_4, %c0_5, %c0_6] : memref<1x4x128xf32, #tpu.memory_space<vmem>>, vector<1x4x128xf32>
    %6 = vector.shape_cast %5 : vector<1x4x128xf32> to vector<4x128xf32>
    %cst = arith.constant dense<0.000000e+00> : vector<32x128xf32>
    %7 = tpu.matmul %4, %6, %cst {dimension_numbers = #tpu.dot_dimension_numbers<[1], [0], [0], [1], [0, 0, 1, 1], [], []>} : vector<32x4xf32>, vector<4x128xf32>, vector<32x128xf32> -> vector<32x128xf32>
    %8 = arith.addf %3, %7 : vector<32x128xf32>
    %c0_7 = arith.constant 0 : index
    %c0_8 = arith.constant 0 : index
    %9 = vector.load %arg7[%c0_7, %c0_8] : memref<32x128xf32, #tpu.memory_space<vmem>>, vector<32x128xf32>
    tpu.vector_store %arg7[%c0_7, %c0_8], %8 {strides = array<i32>} : memref<32x128xf32, #tpu.memory_space<vmem>>, vector<32x128xf32>,
    %c0_i32_9 = arith.constant 0 : i32
    %10 = arith.cmpi eq, %arg2, %c0_i32_9 : i32
    %11 = arith.extui %10 : i1 to i32
    %c0_i32_10 = arith.constant 0 : i32
    %12 = arith.cmpi ne, %11, %c0_i32_10 : i32
    scf.if %12 {
      %c0_11 = arith.constant 0 : index
      %c0_12 = arith.constant 0 : index
      %13 = vector.load %arg7[%c0_11, %c0_12] : memref<32x128xf32, #tpu.memory_space<vmem>>, vector<32x128xf32>
      %c0_13 = arith.constant 0 : index
      %c0_14 = arith.constant 0 : index
      %14 = vector.load %arg5[%c0_13, %c0_14] : memref<32x1xf32, #tpu.memory_space<vmem>>, vector<32x1xf32>
      %15 = vector.broadcast %14 : vector<32x1xf32> to vector<32x128xf32>
      %16 = arith.addf %13, %15 : vector<32x128xf32>
      %cst_15 = arith.constant 0.000000e+00 : f32
      %17 = vector.broadcast %cst_15 : f32 to vector<32x128xf32>
      %18 = arith.maximumf %16, %17 : vector<32x128xf32>
      %c0_16 = arith.constant 0 : index
      %c0_17 = arith.constant 0 : index
      %c0_18 = arith.constant 0 : index
      %19 = vector.load %arg6[%c0_16, %c0_17, %c0_18] : memref<1x32x128xf32, #tpu.memory_space<vmem>>, vector<1x32x128xf32>
      %20 = vector.shape_cast %19 : vector<1x32x128xf32> to vector<32x128xf32>
      %21 = vector.shape_cast %18 : vector<32x128xf32> to vector<1x32x128xf32>
      tpu.vector_store %arg6[%c0_16, %c0_17, %c0_18], %21 {strides = array<i32>} : memref<1x32x128xf32, #tpu.memory_space<vmem>>, vector<1x32x128xf32>,
    } else {
    }
    return
  }
  func.func @transform_0(%arg0: i32, %arg1: i32, %arg2: i32) -> (i32, i32, i32) {
    %c0_i32 = arith.constant 0 : i32
    return %arg0, %arg2, %arg1 : i32, i32, i32
  }
  func.func @transform_1(%arg0: i32, %arg1: i32, %arg2: i32) -> (i32, i32) {
    %c0_i32 = arith.constant 0 : i32
    %c0_i32_0 = arith.constant 0 : i32
    return %c0_i32, %arg2 : i32, i32
  }
  func.func @transform_2(%arg0: i32, %arg1: i32, %arg2: i32) -> (i32, i32) {
    %c0_i32 = arith.constant 0 : i32
    %c0_i32_0 = arith.constant 0 : i32
    %c0_i32_1 = arith.constant 0 : i32
    return %c0_i32, %c0_i32_0 : i32, i32
  }
  func.func @transform_3(%arg0: i32, %arg1: i32, %arg2: i32) -> (i32, i32, i32) {
    %c0_i32 = arith.constant 0 : i32
    %c0_i32_0 = arith.constant 0 : i32
    return %arg0, %c0_i32, %arg1 : i32, i32, i32
  }
}

</mosaic_0001>

<bundles_post_ra>
// kernel: conv_module_forward.1
= control target key start
LH: loop header
LB: loop body
LE: loop exit
PB: predicated region body
PF: predicated region fallthrough
CT: control target
= control target key end

     0   :  { %s717_s12 = smov 0   ;;  %s719_s13 = smov 0   ;;  %s840_s0 = inlined_call_operand.vmem [shape: f32[2,4,256], index: 0, kind: input, shape index: {}]   ;;  %s841_s1 = inlined_call_operand.vmem [shape: f32[32,4], index: 1, kind: input, shape index: {}]   ;;  %s842_s2 = inlined_call_operand.vmem [shape: f32[32,1], index: 2, kind: input, shape index: {}]   ;;  %s843_s3 = inlined_call_operand.vmem [shape: f32[2,32,256], index: 3, kind: output, shape index: {}]  }
   0x1   :  { %s721_s14 = smov 0   ;;  %s723_s15 = smov 0  }
   0x2   :  { %s725_s16 = smov 0   ;;  %s727_s17 = smov 0  }
   0x3   :  { %s729_s18 = smov 0  }
   0x4 LB: > { %s28_s19 = sadd.s32 1, %s686_s16  ;;  %s32_s20 = sadd.s32 1, %s690_s17  ;;  %s694_s18 = sphi %s729_s18, %s13_s18   ;;  %s690_s17 = sphi %s727_s17, %s850_s17   ;;  %s686_s16 = sphi %s725_s16, %s849_s16   ;;  %s682_s15 = sphi %s723_s15, %s848_s15   ;;  %s678_s14 = sphi %s721_s14, %s847_s14   ;;  %s674_s13 = sphi %s719_s13, %s846_s13   ;;  %s670_s12 = sphi %s717_s12, %s845_s12  }
   0x5   : > { %p30_p0 = scmp.ge.s32.totalorder %s28_s19, 2  ;;  %s547_s21 = sadd.s32 4294967295, %s694_s18  }
   0x6   : > { %p128_p1 = scmp.ne.s32.totalorder %s674_s13, %s670_s12  ;;  %p129_p2 = scmp.eq.s32.totalorder %s547_s21, 3 }
   0x7   : > { %s852_s19 = smov (%p30_p0, %s28_s19), 0  ;;  %s854_s20 = smov (!%p30_p0, %s32_s20), %s690_s17 }
   0x8   : > { %s114_s22 = ssub.s32 %s686_s16, %s852_s19  ;;  %p34_p3 = scmp.ge.s32.totalorder %s854_s20, 2 }
   0x9   : > { %p552_p4 = scmp.ge.s32.totalorder %s694_s18, 1  ;;  %p763_p5 = por %p129_p2, %p128_p1 }
   0xa   : > { %p178_p6 = scmp.lt.s32.totalorder %s694_s18, 5  ;;  %s856_s20 = smov (%p34_p3, %s854_s20), 0 }
   0xb   : > { %s113_s24 = ssub.s32 %s690_s17, %s856_s20  ;;  %s118_s26 = sadd.s32 1, %s674_s13 }
   0xc   : > { %p179_p7 = pnand %p552_p4, %p178_p6  ;;  %s115_s25 = sor.u32 %s114_s22, %s113_s24 }
   0xd   : > { %p116_p8 = scmp.eq.s32.totalorder %s115_s25, 0  ;;  %p212_p9 = scmp.lt.s32.totalorder (!%p179_p7), %s682_s15, 1  ;;  %v240_v0 = vld [vmem:[%s841_s1] sm:$0xff] (!%p179_p7)  ;;  %vm245_vm0 = vcmask (!%p179_p7), 31744   ;;  %v242_v1 = vld [vmem:[%s841_s1 + $0x10] sm:$0xff] (!%p179_p7)  ;;  %v696_v3 = vmov (!%p179_p7), 0  }
   0xe   : > { %182 = sbr.rel (%p179_p7) target bundleno = 256 (0x100), region = 32  ;;  %p216_p10 = scmp.lt.s32.totalorder (!%p179_p7), %s678_s14, 1  ;;  %573 = vmatprep.mubr.msk.f32.mxu0 (!%p179_p7), %vm245_vm0, %v240_v0  ;;  %576 = vmatprep.mubr.msk.f32.mxu1 (!%p179_p7), %vm245_vm0, %v242_v1  ;;  %v364_v2 = vld [vmem:[%s842_s2 + $0x10] sm:$0xff] (!%p179_p7)  ;;  %v362_v4 = vld [vmem:[%s842_s2] sm:$0xff] (!%p179_p7)  ;;  %v365_v5 = vld [vmem:[%s842_s2 + $0x18] sm:$0xff] (!%p179_p7)  ;;  %vm258_vm1 = vcmask (!%p179_p7), 1043456  }
   0xf   : > { %s774_s27 = scalar_select %p116_p8, %s674_s13, %s118_s26  }
  0x10   : > { %639 = vset.pattern.permute.xlu1 (!%p179_p7), %v696_v3  ;;  %638 = vset.pattern.permute.xlu0 (!%p179_p7), %v696_v3  ;;  %v363_v6 = vld [vmem:[%s842_s2 + $0x8] sm:$0xff] (!%p179_p7)  ;;  %v243_v9 = vld [vmem:[%s841_s1 + $0x18] sm:$0xff] (!%p179_p7)  ;;  %s209_s9 = sand.u32 (!%p179_p7), 1, %s670_s12  }
  0x11   : > { %378 = vperm.xlu1 (!%p179_p7), %639, %v364_v2   ;;  %368 = vperm.xlu0 (!%p179_p7), %638, %v362_v4   ;;  %v241_v8 = vld [vmem:[%s841_s1 + $0x8] sm:$0xff] (!%p179_p7) }
  0x15   : > { %s213_s7 = scalar_select %p212_p9, %s682_s15, 1  ;;  %383 = vperm.xlu1 %639, %v365_v5   ;;  %373 = vperm.xlu0 %638, %v363_v6  }
  0x16   : > { %s217_s10 = scalar_select %p216_p10, %s678_s14, 1 }
  0x17   : > { %s554_s11 = sshll.u32 %s213_s7, 1  ;;  %s562_s12 = sshll.u32 (%p763_p5), %s682_s15, 3 }
  0x18   : > { %s221_s26 = sadd.s32 %s554_s11, %s217_s10  ;;  %s553_s10 = sshll.u32 %s209_s9, 5 }
  0x19   : > { %s555_s28 = sshll.u32 %s221_s26, 2  ;;  %s211_s11 = scalar_lea.vmem [#allocation3], %s553_s10 }
  0x1a   : > { %s223_s4 = scalar_lea.vmem %s840_s0, %s555_s28  ;;  %s406_s21 = sadd.s32 (%p763_p5), %s678_s14, %s562_s12 }
  0x1b   : > { %v244_v7 = vld [vmem:[%s223_s4] sm:$0xf]  ;;  %s563_s22 = sshll.u32 (%p763_p5), %s406_s21, 3 }
  0x1c   : > { %571 = vmatprep.subr.msk.mxu0 %vm258_vm1, %v244_v7  ;;  %579 = vmatprep.subr.msk.mxu1 %vm258_vm1, %v244_v7  ;;  %s408_s26 = scalar_lea.vmem (%p763_p5), %s843_s3, %s563_s22 }
  0x1d   : > { %572 = vmatpush3.msk.msra.mxu0 %vm258_vm1, %v244_v7  ;;  %580 = vmatpush3.msk.msra.mxu1 %vm258_vm1, %v244_v7 }
  0x1e   : > { %574 = vmatmul.mubr.msk.f32.vlgmr.msra.gmra.mrb[0].mxu0 %vm245_vm0, %v241_v8  ;;  %577 = vmatmul.mubr.msk.f32.vlgmr.msra.gmra.mrb[0].mxu1 %vm245_vm0, %v243_v9 }
  0x90   : > { %v379_v10 = vpop.permute.xlu1 %378  ;;  %v369_v11 = vpop.permute.xlu0 %368 }
  0x94   : > { %v384_v12 = vpop.permute.xlu1 %383  ;;  %v374_v13 = vpop.permute.xlu0 %373 }
  0xf1   : > { %v575_v14 = vpop.f32.mrb[0].mxu0  ;;  %v578_v15 = vpop.f32.mrb[0].mxu1  ;;  %404 = sbr.rel (!%p763_p5) target bundleno = 256 (0x100), region = 44 }
  0xf2   : > { %v387_v16 = vadd.f32 %v575_v14, %v374_v13  ;;  %v389_v17 = vadd.f32 %v578_v15, %v384_v12  ;;  %v328_v18 = vpop.f32.mrb[1].mxu0  ;;  %v338_v19 = vpop.f32.mrb[1].mxu1 }
  0xf3   : > { %v386_v20 = vadd.f32 %v369_v11, %v328_v18  ;;  %v388_v21 = vadd.f32 %v379_v10, %v338_v19 }
  0xf4   : > { %v391_v22 = vmax.f32 %v387_v16, 0.0  ;;  %v393_v23 = vmax.f32 %v389_v17, 0.0 }
  0xf5   : > { %v390_v24 = vmax.f32 %v386_v20, 0.0  ;;  %v392_v25 = vmax.f32 %v388_v21, 0.0 }
  0xf6   : > { %395 = vst [vmem:[%s211_s11 + $0x8] sm:$0xff] %v391_v22  ;;  %397 = vst [vmem:[%s211_s11 + $0x18] sm:$0xff] %v393_v23 }
  0xf7   : > { %394 = vst [vmem:[%s211_s11] sm:$0xff] %v390_v24  ;;  %396 = vst [vmem:[%s211_s11 + $0x10] sm:$0xff] %v392_v25 }
  0xfd   : > { %v444_v27 = vld [vmem:[%s211_s11 + $0x8] sm:$0xff]  ;;  %v448_v29 = vld [vmem:[%s211_s11 + $0x18] sm:$0xff] }
  0xfe   : > { %v442_v26 = vld [vmem:[%s211_s11] sm:$0xff]  ;;  %v446_v28 = vld [vmem:[%s211_s11 + $0x10] sm:$0xff]  ;;  %445 = vst [vmem:[%s408_s26 + $0x10] sm:$0xff] %v444_v27  ;;  %449 = vst [vmem:[%s408_s26 + $0x30] sm:$0xff] %v448_v29 }
  0xff   : > { %443 = vst [vmem:[%s408_s26] sm:$0xff] %v442_v26  ;;  %447 = vst [vmem:[%s408_s26 + $0x20] sm:$0xff] %v446_v28 }
 0x100 PF: > { %s13_s18 = sadd.s32 1, %s694_s18   ;;  %s845_s12 = smov %s674_s13 }
 0x101   : > { %p10_p11 = scmp.ge.s32.totalorder %s13_s18, 6   ;;  %s846_s13 = smov %s774_s27 }
 0x102   : > { %s847_s14 = smov %s686_s16  ;;  %s848_s15 = smov %s690_s17 }
 0x103   : > { %s849_s16 = smov %s852_s19  ;;  %s850_s17 = smov %s856_s20 }
 0x104   :  { %12 = sbr.rel (!%p10_p11) target bundleno = 4 (0x4), region = 111 }

</bundles_post_ra>
